<compile_context>
chip_gen: v6e
topology: v6e:2x2x1
jax: 0.10.0
libtpu: 0.0.40
codegen_flags: <defaults>
</compile_context>

<pallas_src>
import jax
import jax.numpy as jnp
from jax.experimental import pallas as pl
from jax.experimental.pallas import tpu as pltpu

_LANE = 128
_SUBLANE = 8


def _round_up(v, m):
    return ((v + m - 1) // m) * m


def _aggregation_kernel(w_ref, b_ref, x_ref, out_ref, attn_ref):
    # w_ref:    (1, D)       linear weight row (VMEM, resident across steps)
    # b_ref:    (1, 1)       linear bias (SMEM scalar, f32)
    # x_ref:    (TB, N, D)   slab of TB batch rows, native dtype
    # out_ref:  (TB, D)      weighted-sum output
    # attn_ref: (TB, N_pad)  lane-dense (128-padded) attention weights
    x = x_ref[...]                                   # native dtype, no f32 copy
    w = w_ref[...]                                   # (1, D) native dtype
    b = b_ref[0, 0]                                  # f32 scalar from SMEM

    tb, n, d = x.shape
    n_pad = attn_ref.shape[-1]

    # scores = x @ w^T + b: native-dtype VPU multiply, f32-accumulated lane
    # reduce over D -> lane-dense (TB, N).  Avoids both an f32 slab copy and a
    # lane-width-1 MXU matmul.
    scores = jnp.sum(x * w, axis=-1, dtype=jnp.float32) + b      # (TB, N) f32

    # softmax over N (dim=1 of the original (B, N, 1) tensor).
    m = jnp.max(scores, axis=-1, keepdims=True)                  # (TB, 1)
    e = jnp.exp(scores - m)                                      # (TB, N)
    denom = jnp.sum(e, axis=-1, keepdims=True)                   # (TB, 1)
    attn = e * pl.reciprocal(denom, approx=False)                # (TB, N) f32

    # Single cast shared by the store and the weighted sum.
    attn_x = attn.astype(x.dtype)                                # (TB, N)

    # Dense, 128-lane-aligned store of the attention weights.
    if n_pad > n:
        pad = jnp.zeros((tb, n_pad - n), dtype=attn_x.dtype)
        attn_ref[...] = jnp.concatenate([attn_x, pad], axis=-1)
    else:
        attn_ref[...] = attn_x

    # Weighted sum over N: native-dtype multiply, f32-accumulated sublane
    # reduce.  One path for all chips (kernel is HBM-bound; exact for f32).
    out = jnp.sum(x * attn_x[:, :, None], axis=1, dtype=jnp.float32)  # (TB, D)
    out_ref[...] = out.astype(out_ref.dtype)


def _pick_tb(B, N, D, itemsize, feat_budget):
    """Batch-tile size: multiple of 8 (or exactly B), sized against feat_budget,
    and small enough that the parallel grid has >= 2 steps when possible."""
    if B <= _SUBLANE:
        return B
    per_row = max(1, N * D * itemsize)
    tb = min(B, max(1, feat_budget // per_row))
    tb = max(_SUBLANE, (tb // _SUBLANE) * _SUBLANE)
    if tb >= B:
        # Keep >= 2 grid steps so both v7x TensorCores get work.
        tb = max(_SUBLANE, ((B // 2) // _SUBLANE) * _SUBLANE)
    return tb


def aggregation_module(features, weight, bias, *, tb=None):
    """features: (B, N, D); weight: (1, D) as in nn.Linear(D, 1); bias: (1,)."""
    B, N, D = features.shape
    dtype = features.dtype
    itemsize = jnp.dtype(dtype).itemsize

    # Generation-aware VMEM budgeting.
    try:
        vmem_cap = getattr(pltpu.get_tpu_info(), "vmem_capacity_bytes", 64 * 2**20)
    except Exception:
        vmem_cap = 64 * 2**20                       # conservative (v7x-class)
    if vmem_cap <= 80 * 2**20:                      # v7x-class: 64 MiB physical/TC
        feat_budget, vmem_cap_limit = 6 * 2**20, 40 * 2**20
    else:                                           # v5e / v6e: 128 MiB physical
        feat_budget, vmem_cap_limit = 14 * 2**20, 64 * 2**20

    if tb is None:
        tb = _pick_tb(B, N, D, itemsize, feat_budget)
    else:
        tb = max(1, min(int(tb), B))
        if tb < B and tb % _SUBLANE != 0:           # keep (8,128) rule satisfied
            tb = min(B, _round_up(tb, _SUBLANE))

    grid_len = (B + tb - 1) // tb
    b_pad = grid_len * tb

    feats_in = features
    if b_pad != B:                                  # pad batch; sliced off below
        feats_in = jnp.concatenate(
            [features, jnp.zeros((b_pad - B, N, D), dtype)], axis=0)

    n_pad = N if N % _LANE == 0 else _round_up(N, _LANE)

    w_row = weight.reshape(1, D).astype(dtype)      # native-dtype multiply
    b_smem = bias.reshape(1, 1).astype(jnp.float32)

    # VMEM estimate including in-kernel f32 intermediates (worst case).
    est_bytes = (
        2 * tb * N * D * itemsize                   # double-buffered feature slabs
        + 2 * tb * N * D * 4                        # elementwise/convert temps (f32)
        + 2 * tb * (D + n_pad) * itemsize           # double-buffered outputs
        + 8 * tb * (n_pad + D) * 4                  # f32 score/exp/attn/out rows
        + 2 * D * itemsize                          # weight tile
        + (1 << 16)                                 # slack / compiler scratch
    )
    vmem_limit = int(min(vmem_cap_limit, max(32 * 2**20, (est_bytes * 5) // 4)))

    out, attn = pl.pallas_call(
        _aggregation_kernel,
        out_shape=(
            jax.ShapeDtypeStruct((b_pad, D), dtype),
            jax.ShapeDtypeStruct((b_pad, n_pad), dtype),   # lane-dense attn
        ),
        grid_spec=pltpu.PrefetchScalarGridSpec(
            num_scalar_prefetch=0,
            grid=(grid_len,),
            in_specs=[
                pl.BlockSpec((1, D), lambda i: (0, 0)),             # weight (shared)
                pl.BlockSpec(memory_space=pltpu.MemorySpace.SMEM),  # bias scalar
                pl.BlockSpec((tb, N, D), lambda i: (i, 0, 0)),      # features slab
            ],
            out_specs=[
                pl.BlockSpec((tb, D), lambda i: (i, 0)),
                pl.BlockSpec((tb, n_pad), lambda i: (i, 0)),
            ],
        ),
        compiler_params=pltpu.CompilerParams(
            dimension_semantics=("parallel",),
            vmem_limit_bytes=vmem_limit,
        ),
    )(w_row, b_smem, feats_in)

    # Layout plumbing back to the PyTorch shapes.
    if b_pad != B:
        out = out[:B]
        attn = attn[:B]
    if n_pad != N:
        attn = attn[:, :N]
    return out, attn.reshape(B, N, 1)


def _reference(features, weight, bias):
    # Pure-JAX reference matching the PyTorch module.
    scores = jnp.einsum("bnd,od->bno", features, weight) + bias   # (B, N, 1)
    attn = jax.nn.softmax(scores, axis=1)
    weighted = features * attn
    return jnp.sum(weighted, axis=1), attn


if __name__ == "__main__":
    key = jax.random.PRNGKey(0)
    k_feat, k_w, k_b = jax.random.split(key, 3)

    B, N, D = 2, 8, 32  # batch, instances (softmax axis), path_input_dim
    features = jax.random.normal(k_feat, (B, N, D), dtype=jnp.float32)

    # Deterministic Linear(path_input_dim, 1) parameters (synthetic init).
    weight = jax.random.normal(k_w, (1, D), dtype=jnp.float32) * (1.0 / jnp.sqrt(D))
    bias = jax.random.normal(k_b, (1,), dtype=jnp.float32) * 0.01

    out, attn = aggregation_module(features, weight, bias)
    out = jax.block_until_ready(out)
    attn = jax.block_until_ready(attn)

    ref_out, ref_attn = _reference(features, weight, bias)
    assert out.shape == (B, D)
    assert attn.shape == (B, N, 1)
    assert jnp.allclose(out, ref_out, atol=1e-5, rtol=1e-5)
    assert jnp.allclose(attn, ref_attn, atol=1e-5, rtol=1e-5)

    print("KERNEL_OK")
</pallas_src>

<mosaic_0001>
module attributes {stable_mosaic.version = 11 : i64} {
  func.func @_aggregation_kernel(%arg0: i32, %arg1: memref<1x32xf32, #tpu.memory_space<vmem>>, %arg2: memref<1x1xf32, #tpu.memory_space<smem>>, %arg3: memref<2x8x32xf32, #tpu.memory_space<vmem>>, %arg4: memref<2x32xf32, #tpu.memory_space<vmem>>, %arg5: memref<2x128xf32, #tpu.memory_space<vmem>>) attributes {dimension_semantics = [#tpu.dimension_semantics<parallel>], iteration_bounds = array<i64: 1>, scalar_prefetch = 0 : i64, scratch_operands = 0 : i64, tpu.core_type = #tpu.core_type<tc>, window_params = [{pipeline_mode = #tpu.pipeline_mode<synchronous>, transform_indices = @transform_0, window_bounds = array<i64: 1, 32>}, {transform_indices = @transform_1, window_bounds = array<i64: 1, 1>}, {transform_indices = @transform_2, window_bounds = array<i64: 2, 8, 32>}, {transform_indices = @transform_3, window_bounds = array<i64: 2, 32>}, {transform_indices = @transform_4, window_bounds = array<i64: 2, 128>}]} {
    %c0 = arith.constant 0 : index
    %c0_0 = arith.constant 0 : index
    %c0_1 = arith.constant 0 : index
    %0 = vector.load %arg3[%c0, %c0_0, %c0_1] : memref<2x8x32xf32, #tpu.memory_space<vmem>>, vector<2x8x32xf32>
    %c0_2 = arith.constant 0 : index
    %c0_3 = arith.constant 0 : index
    %1 = vector.load %arg1[%c0_2, %c0_3] : memref<1x32xf32, #tpu.memory_space<vmem>>, vector<1x32xf32>
    %c0_4 = arith.constant 0 : index
    %c0_5 = arith.constant 0 : index
    %2 = memref.load %arg2[%c0_4, %c0_5] : memref<1x1xf32, #tpu.memory_space<smem>>
    %3 = vector.shape_cast %1 : vector<1x32xf32> to vector<1x1x32xf32>
    %4 = vector.broadcast %3 : vector<1x1x32xf32> to vector<2x8x32xf32>
    %5 = arith.mulf %0, %4 : vector<2x8x32xf32>
    %cst = arith.constant dense<0.000000e+00> : vector<2x8xf32>
    %6 = vector.multi_reduction <add>, %5, %cst [2] : vector<2x8x32xf32> to vector<2x8xf32>
    %7 = vector.broadcast %2 : f32 to vector<2x8xf32>
    %8 = arith.addf %6, %7 : vector<2x8xf32>
    %cst_6 = arith.constant dense<0xFF800000> : vector<2xf32>
    %9 = vector.multi_reduction <maximumf>, %8, %cst_6 [1] : vector<2x8xf32> to vector<2xf32>
    %10 = vector.shape_cast %9 : vector<2xf32> to vector<2x1xf32>
    %11 = vector.broadcast %10 : vector<2x1xf32> to vector<2x8xf32>
    %12 = arith.subf %8, %11 : vector<2x8xf32>
    %13 = math.exp %12 : vector<2x8xf32>
    %cst_7 = arith.constant dense<0.000000e+00> : vector<2xf32>
    %14 = vector.multi_reduction <add>, %13, %cst_7 [1] : vector<2x8xf32> to vector<2xf32>
    %15 = vector.shape_cast %14 : vector<2xf32> to vector<2x1xf32>
    %16 = tpu.reciprocal %15 : vector<2x1xf32> -> vector<2x1xf32>
    %17 = vector.broadcast %16 : vector<2x1xf32> to vector<2x8xf32>
    %18 = arith.mulf %13, %17 : vector<2x8xf32>
    %cst_8 = arith.constant 0.000000e+00 : f32
    %19 = vector.broadcast %cst_8 : f32 to vector<2x120xf32>
    %20 = tpu.concatenate %18, %19 in 1 : vector<2x8xf32>, vector<2x120xf32> -> vector<2x128xf32>
    %c0_9 = arith.constant 0 : index
    %c0_10 = arith.constant 0 : index
    %21 = vector.load %arg5[%c0_9, %c0_10] : memref<2x128xf32, #tpu.memory_space<vmem>>, vector<2x128xf32>
    tpu.vector_store %arg5[%c0_9, %c0_10], %20 {strides = array<i32>} : memref<2x128xf32, #tpu.memory_space<vmem>>, vector<2x128xf32>,
    %22 = vector.shape_cast %18 : vector<2x8xf32> to vector<2x8x1xf32>
    %23 = vector.broadcast %22 : vector<2x8x1xf32> to vector<2x8x32xf32>
    %24 = arith.mulf %0, %23 : vector<2x8x32xf32>
    %cst_11 = arith.constant dense<0.000000e+00> : vector<2x32xf32>
    %25 = vector.multi_reduction <add>, %24, %cst_11 [1] : vector<2x8x32xf32> to vector<2x32xf32>
    %c0_12 = arith.constant 0 : index
    %c0_13 = arith.constant 0 : index
    %26 = vector.load %arg4[%c0_12, %c0_13] : memref<2x32xf32, #tpu.memory_space<vmem>>, vector<2x32xf32>
    tpu.vector_store %arg4[%c0_12, %c0_13], %25 {strides = array<i32>} : memref<2x32xf32, #tpu.memory_space<vmem>>, vector<2x32xf32>,
    return
  }
  func.func @transform_0(%arg0: i32) -> (i32, i32) {
    %c0_i32 = arith.constant 0 : i32
    %c0_i32_0 = arith.constant 0 : i32
    %c0_i32_1 = arith.constant 0 : i32
    return %c0_i32, %c0_i32_0 : i32, i32
  }
  func.func @transform_1(%arg0: i32) -> (i32, i32) {
    %c0_i32 = arith.constant 0 : i32
    %c0_i32_0 = arith.constant 0 : i32
    %c0_i32_1 = arith.constant 0 : i32
    return %c0_i32, %c0_i32_0 : i32, i32
  }
  func.func @transform_2(%arg0: i32) -> (i32, i32, i32) {
    %c0_i32 = arith.constant 0 : i32
    %c0_i32_0 = arith.constant 0 : i32
    %c0_i32_1 = arith.constant 0 : i32
    return %arg0, %c0_i32, %c0_i32_0 : i32, i32, i32
  }
  func.func @transform_3(%arg0: i32) -> (i32, i32) {
    %c0_i32 = arith.constant 0 : i32
    %c0_i32_0 = arith.constant 0 : i32
    return %arg0, %c0_i32 : i32, i32
  }
  func.func @transform_4(%arg0: i32) -> (i32, i32) {
    %c0_i32 = arith.constant 0 : i32
    %c0_i32_0 = arith.constant 0 : i32
    return %arg0, %c0_i32 : i32, i32
  }
}

</mosaic_0001>

<bundles_post_ra>
// kernel: tpu_custom_call.1
= control target key start
LH: loop header
LB: loop body
LE: loop exit
PB: predicated region body
PF: predicated region fallthrough
CT: control target
= control target key end

     0   :  { %11 = vsyncpa [#allocation4], 0  ;;  %s341_s0 = inlined_call_operand.vmem [shape: f32[1,32], index: 0, kind: input, shape index: {}]   ;;  %s342_s1 = inlined_call_operand.<no memory space> [shape: f32[1,1], index: 1, kind: input, shape index: {}]   ;;  %s343_s2 = inlined_call_operand.hbm [shape: f32[2,8,32], index: 2, kind: input, shape index: {}]   ;;  %s344_s3 = inlined_call_operand.hbm [shape: f32[2,32], index: 3, kind: output, shape index: {0}]   ;;  %s345_s4 = inlined_call_operand.hbm [shape: f32[2,128], index: 4, kind: output, shape index: {1}]  }
   0x1   :  { %12 = vsyncpa [#allocation5], 0 }
   0x2   :  { %13 = vsyncpa [#allocation8], 0  ;;  %s281_s15 = smov [#allocation3]  }
   0x3   :  { %s23_s16 = sshll.u32 %s281_s15, 4  ;;  %s24_s16 = int_to_ptr.vmem [resolvable:$true] %s23_s16 }
   0x4   :  { %s223_s17 = scalar_lea.vmem %s24_s16, 256  ;;  %p228_p1 = scmp.lt.s32.totalorder %s24_s16, %s24_s16 }
   0x5   :  { %p224_p0 = scmp.ne.s32.totalorder %s24_s16, %s223_s17  ;;  %p229_p2 = scmp.lt.s32.totalorder %s223_s17, %s223_s17 }
   0x7   :  { %p230_p3 = por %p229_p2, %p228_p1 }
   0x9   :  { %p231_p4 = pnand %p230_p3, %p224_p0 }
   0xb   :  { %234 = shalt.err (!%p231_p4)
}
   0xc   :  { %s282_s18 = smov 128   ;;  %s283_s19 = smov 8  }
   0xd   :  { %29 = dma.hbm_to_vmem [thread:$0]  %s343_s2, 256, %s24_s16, [#allocation4], %s282_s18, %s282_s18, %s283_s19  }
   0xe   :  { %275 = dma.done.wait [#allocation4], 256  }
   0xf   :  { %276 = vsyncadd [#allocation4], 4294967040  ;;  %v33_v0 = vld [vmem:[#allocation3] sm:$0xff]  ;;  %vm45_vm0 = vcmask 261120   ;;  %v318_v2 = vld [vmem:[#allocation3 + $0x8] sm:$0xff]  ;;  %v57_v7 = vlaneseq  ;;  %v52_v10 = vstv %s342_s1  ;;  %vm67_vm1 = vcmask 1041409  }
  0x10   :  { %v200_v1 = vld [vmem:[%s341_s0] ss:$0 sm:$0xff]  ;;  %vm70_vm2 = vcmask 58368   ;;  %v284_v20 = vmov 0   ;;  %s285_s0 = smov [#allocation7]   ;;  %vm144_vm3 = vcmask 64512  }
  0x11   :  { %v43_v3 = vmul.f32 %v200_v1, %v33_v0  ;;  %v44_v4 = vmul.f32 %v200_v1, %v318_v2  ;;  %v58_v8 = vand.u32 127, %v57_v7  ;;  %v60_v9 = vshrl.u32 %v57_v7, 7  ;;  %208 = vset.pattern.permute.xlu0 %v284_v20  ;;  %207 = vset.pattern.permute.xlu1 %v284_v20  ;;  %s187_s1 = sshll.u32 %s285_s0, 4  ;;  %s188_s1 = int_to_ptr.vmem [resolvable:$true] %s187_s1 }
  0x12   :  { %s235_s25 = scalar_lea.vmem %s188_s1, 32  ;;  %p240_p6 = scmp.lt.s32.totalorder %s188_s1, %s188_s1 }
  0x13   :  { %v46_v5 = vsel %vm45_vm0, %v43_v3, 0.0  ;;  %v49_v6 = vsel %vm45_vm0, %v44_v4, 0.0  ;;  %v61_v12 = vsub.s32 %v58_v8, %v60_v9  ;;  %v77_v21 = vsub.s32 0, %v60_v9  ;;  %p236_p5 = scmp.ne.s32.totalorder %s188_s1, %s235_s25  ;;  %p241_p7 = scmp.lt.s32.totalorder %s235_s25, %s235_s25 }
  0x14   :  { %47 = vadd.xlane.f32.xlu0 %v46_v5  ;;  %v81_v22 = vsub.s32 1, %v60_v9 }
  0x15   :  { %p242_p8 = por %p241_p7, %p240_p6 }
  0x17   :  { %p243_p9 = pnand %p242_p8, %p236_p5 }
  0x18   :  { %50 = vadd.xlane.f32.xlu0 %v49_v6 }
  0x9d   :  { %v48_v11 = vpop.xlane.xlu0 %47 }
  0x9e   :  { %v53_v13 = vadd.f32 %v52_v10, %v48_v11 }
  0xa0   :  { %v62_v16 = vrot.slane %v53_v13, %v61_v12 }
  0xa1   :  { %v51_v14 = vpop.xlane.xlu0 %50 }
  0xa2   :  { %v54_v15 = vadd.f32 %v52_v10, %v51_v14 }
  0xa4   :  { %v66_v17 = vrot.slane %v54_v15, %v61_v12 }
  0xa6   :  { %v68_v18 = vsel %vm67_vm1, %v66_v17, %v62_v16 }
  0xa7   :  { %v71_v19 = vsel %vm70_vm2, %v68_v18, -inf }
  0xa8   :  { %72 = vmax.xlane.f32.xlu1 %v71_v19 }
 0x131   :  { %v73_v23 = vpop.xlane.xlu1 %72 }
 0x132   :  { %v78_v24 = vrot.slane %v73_v23, %v77_v21  ;;  %v82_v25 = vrot.slane %v73_v23, %v81_v22 }
 0x134   :  { %v85_v26 = vsub.f32 %v53_v13, %v78_v24  ;;  %v86_v27 = vsub.f32 %v54_v15, %v82_v25 }
 0x136   :  { %v87_v28 = vmul.f32 1.442695, %v85_v26  ;;  %v89_v29 = vmul.f32 1.442695, %v86_v27 }
 0x138   :  { %209 = vpow2.f32 %v87_v28 }
 0x139   :  { %211 = vpow2.f32 %v89_v29 }
 0x145   :  { %v210_v30 = vpop.eup %209 }
 0x146   :  { %v212_v31 = vpop.eup %211  ;;  %94 = vperm.xlu1 %207, %v210_v30  }
 0x147   :  { %97 = vperm.xlu0 %208, %v212_v31  }
 0x1c1   :  { %v95_v32 = vpop.permute.xlu1 %94 }
 0x1c2   :  { %v98_v33 = vpop.permute.xlu0 %97  ;;  %v102_v34 = vrot.slane %v95_v32, %v61_v12 }
 0x1c3   :  { %v106_v35 = vrot.slane %v98_v33, %v61_v12 }
 0x1c5   :  { %v107_v36 = vsel %vm67_vm1, %v106_v35, %v102_v34 }
 0x1c6   :  { %v109_v37 = vsel %vm70_vm2, %v107_v36, 0.0 }
 0x1c7   :  { %110 = vadd.xlane.f32.xlu1 %v109_v37 }
 0x250   :  { %v111_v38 = vpop.xlane.xlu1 %110 }
 0x251   :  { %213 = vrcp.f32 %v111_v38 }
 0x25e   :  { %v214_v39 = vpop.eup %213 }
 0x25f   :  { %v117_v40 = vrot.slane %v214_v39, %v77_v21  ;;  %v121_v42 = vrot.slane %v214_v39, %v81_v22 }
 0x261   :  { %v124_v41 = vmul.f32 %v210_v30, %v117_v40  ;;  %v125_v43 = vmul.f32 %v212_v31, %v121_v42 }
 0x263   :  { %129 = vperm.xlu0 %208, %v124_v41  }
 0x267   :  { %132 = vperm.xlu0 %208, %v125_v43  }
 0x2de   :  { %v130_v44 = vpop.permute.xlu0 %129 }
 0x2df   :  { %v149_v45 = vmul.f32 %v130_v44, %v33_v0  ;;  %v137_v49 = vrot.slane %v130_v44, %v61_v12 }
 0x2e1   :  { %v151_v46 = vsel %vm45_vm0, %v149_v45, 0.0 }
 0x2e2   :  { %v152_v47 = vrot.slane %v151_v46, 4  ;;  %v133_v48 = vpop.permute.xlu0 %132 }
 0x2e3   :  { %v141_v50 = vrot.slane %v133_v48, %v61_v12  ;;  %v150_v51 = vmul.f32 %v133_v48, %v318_v2 }
 0x2e4   :  { %v153_v52 = vadd.f32 %v152_v47, %v151_v46 }
 0x2e5   :  { %v158_v53 = vsel %vm45_vm0, %v150_v51, 0.0  ;;  %v142_v54 = vsel %vm67_vm1, %v141_v50, %v137_v49 }
 0x2e6   :  { %v154_v55 = vrot.slane %v153_v52, 2  ;;  %v159_v56 = vrot.slane %v158_v53, 4  ;;  %v145_v57 = vsel %vm144_vm3, %v142_v54, 0.0 }
 0x2e7   :  { %146 = vst [vmem:[#allocation7] sm:$0x3] %v145_v57 }
 0x2e8   :  { %v155_v58 = vadd.f32 %v154_v55, %v153_v52  ;;  %v160_v59 = vadd.f32 %v159_v56, %v158_v53 }
 0x2e9   :  { %246 = shalt.err (!%p243_p9)
}
 0x2ea   :  { %190 = dma.vmem_to_hbm [thread:$0]  %s188_s1, 32, %s345_s4, [#allocation8]   ;;  %v161_v60 = vrot.slane %v160_v59, 2  ;;  %v156_v61 = vrot.slane %v155_v58, 1  ;;  %vm169_vm4 = vcmask 254976  }
 0x2eb   :  { %s286_s28 = smov [#allocation6]  }
 0x2ec   :  { %v162_v62 = vadd.f32 %v161_v60, %v160_v59  ;;  %s177_s29 = sshll.u32 %s286_s28, 4  ;;  %v157_v1 = vadd.f32 %v156_v61, %v155_v58  ;;  %s178_s29 = int_to_ptr.vmem [resolvable:$true] %s177_s29 }
 0x2ed   :  { %s255_s30 = scalar_lea.vmem %s178_s29, 32  ;;  %p260_p11 = scmp.lt.s32.totalorder %s178_s29, %s178_s29 }
 0x2ee   :  { %v163_v63 = vrot.slane %v162_v62, 1  ;;  %p256_p10 = scmp.ne.s32.totalorder %s178_s29, %s255_s30  ;;  %p261_p12 = scmp.lt.s32.totalorder %s255_s30, %s255_s30 }
 0x2f0   :  { %v164_v0 = vadd.f32 %v163_v63, %v162_v62  ;;  %p262_p13 = por %p261_p12, %p260_p11 }
 0x2f2   :  { %v167_v2 = vsel %vm67_vm1, %v164_v0, %v157_v1  ;;  %p263_p0 = pnand %p262_p13, %p256_p10 }
 0x2f3   :  { %170 = vst.msk [vmem:[#allocation6] sm:$0x3] %vm169_vm4, %v167_v2 }
 0x2f4   :  { %266 = shalt.err (!%p263_p0)
}
 0x2f5   :  { %180 = dma.vmem_to_hbm [thread:$0]  %s178_s29, 32, %s344_s3, [#allocation5]  }
 0x2f6   :  { %277 = dma.done.wait [#allocation5], 32  }
 0x2f7   :  { %278 = vsyncadd [#allocation5], 4294967264 }
 0x2f8   :  { %279 = dma.done.wait [#allocation8], 32  }
 0x2f9   :  { %280 = vsyncadd [#allocation8], 4294967264 }
 0x2fa   :  { %197 = vsyncpa [#allocation4], 1 }
 0x2fb   :  { %198 = vsyncpa [#allocation5], 1 }
 0x2fc   :  { %199 = vsyncpa [#allocation8], 1 }

</bundles_post_ra>
